<compile_context>
chip_gen: v6e
topology: v6e:2x2x1
jax: 0.10.0
libtpu: 0.0.40
codegen_flags: <defaults>
</compile_context>

<pallas_src>
import functools

import jax
import jax.numpy as jnp
from jax import lax
from jax.experimental import pallas as pl
from jax.experimental.pallas import tpu as pltpu

_LANES = 128


def _round_up(x, m):
    return -(-x // m) * m


def _vmem_capacity_bytes():
    """Physical VMEM capacity (per core); conservative fallback if unqueryable."""
    try:
        cap = int(pltpu.get_tpu_info().vmem_capacity_bytes)
        if cap > 0:
            return cap
    except Exception:
        pass
    return 64 * 1024 * 1024  # v7x per-core VMEM (most restrictive)


def _sublane_multiple(itemsize):
    # native tiling: (8,128) f32, (16,128) bf16, (32,128) int8/fp8
    return 8 * max(1, 4 // max(1, itemsize))


def _pick_sublane_tile(s_total, num_classes, itemsize, hw_splits, vmem_cap):
    """Number of 128-lane rows per streamed tile, sized off the VMEM budget."""
    sub_mult = _sublane_multiple(itemsize)
    # ~1/4 of physical VMEM for the (double-buffered) logits + target stream:
    # v5e/v6e -> 32 MiB of stream (~16 MiB logits per buffer), v7x -> 16 MiB.
    budget = max(vmem_cap // 4, 2 * 1024 * 1024)
    per_row = num_classes * _LANES * itemsize + _LANES * 4  # logits + target row
    s_budget = max(sub_mult, (budget // (2 * per_row)) // sub_mult * sub_mult)
    if hw_splits == 1 and s_budget >= s_total:
        return s_total  # a single full-extent tile, no padding needed
    s_split = _round_up(-(-s_total // hw_splits), sub_mult)
    return max(sub_mult, min(s_budget, s_split))


def _pick_chunk(sublanes, sub_mult):
    """Pixel-chunk height for the in-vreg class loop (a few vregs per temp)."""
    for cand in (32, 16, 8):
        if cand % sub_mult == 0 and sublanes % cand == 0:
            return cand
    return sublanes  # tiny full-extent tiles: single chunk


def _focal_kernel(logit_ref, target_ref, neg_alpha_ref, out_ref, acc_ref, *,
                  num_classes, hw, lo, hi, smooth, gamma, sublanes, chunk,
                  tiles_per_split, needs_mask, track_sum):
    # logit_ref   : (1, C, S, 128)  native dtype, VMEM (streamed)
    # target_ref  : (1, 1, S, 128)  int32, VMEM (streamed)
    # neg_alpha   : (C,)            f32, SMEM (-alpha, scalar reads)
    # out_ref     : (1, 1, 1, 128)  f32, per-(batch, split) partial loss sum
    # acc_ref     : (chunk, 128)    f32, running per-lane loss accumulator
    t_idx = pl.program_id(2)

    @pl.when(t_idx == 0)
    def _init():
        acc_ref[...] = jnp.zeros_like(acc_ref)

    # Hoist SMEM scalar reads out of the per-pixel loops.
    neg_alpha = [neg_alpha_ref[c] for c in range(num_classes)]

    n_chunks = sublanes // chunk

    if needs_mask:
        tile_sub = (pl.program_id(1) * tiles_per_split + t_idx) * sublanes
        row_ids = lax.broadcasted_iota(jnp.int32, (chunk, _LANES), 0)
        lane_ids = lax.broadcasted_iota(jnp.int32, (chunk, _LANES), 1)
        base_pix = (tile_sub + row_ids) * _LANES + lane_ids  # hoisted iota
    else:
        base_pix = None

    def chunk_body(ci, carry):
        off = pl.multiple_of(ci * chunk, chunk)
        tgt = target_ref[0, 0, pl.ds(off, chunk), :]                 # (chunk,128) i32
        p_t = jnp.zeros((chunk, _LANES), jnp.float32)
        na_t = jnp.zeros((chunk, _LANES), jnp.float32)
        sum_p = jnp.zeros((chunk, _LANES), jnp.float32) if track_sum else None
        for cls in range(num_classes):                               # C is small
            row = logit_ref[0, cls, pl.ds(off, chunk), :].astype(jnp.float32)
            hit = tgt == cls
            if track_sum:
                sum_p = sum_p + row
            p_t = jnp.where(hit, row, p_t)
            na_t = jnp.where(hit, neg_alpha[cls], na_t)
        # clamp(one_hot, lo, hi) . p  ==  lo*sum_p + (hi-lo)*p_t
        if track_sum:
            pt = lo * sum_p + (hi - lo) * p_t + smooth
        else:
            pt = (hi - lo) * p_t + (lo + smooth)                     # sum_c p == 1
        logpt = jnp.log(pt)
        one_m = 1.0 - pt
        if isinstance(gamma, int):
            focal = one_m ** gamma                  # integer_pow -> multiplies
        else:
            # non-integer gamma: clamp base at 0 to avoid NaN when pt ~ 1+eps
            focal = jnp.power(jnp.maximum(one_m, 0.0), jnp.float32(gamma))
        loss = na_t * focal * logpt                 # na_t == -alpha[target]
        if needs_mask:
            gpix = base_pix + off * _LANES
            loss = jnp.where(gpix < hw, loss, 0.0)
        acc_ref[...] += loss
        return carry

    lax.fori_loop(0, n_chunks, chunk_body, 0, unroll=(n_chunks <= 4))

    @pl.when(t_idx == pl.num_programs(2) - 1)
    def _finalize():
        red = jnp.sum(acc_ref[...])
        out_ref[...] = jnp.zeros(out_ref.shape, out_ref.dtype) + red


def focal_loss(logit, target, alpha, *, gamma=2, smooth=1e-5, size_average=True,
               probs_sum_to_one=False, hw_splits=1, sublane_tile=None):
    """logit: (N, C, H, W) class probabilities; target: (N, 1, H, W) int ids;
    alpha: (C,) per-class weights.  Returns the (N,) per-batch focal loss."""
    N, C = logit.shape[0], logit.shape[1]
    HW = 1
    for d in logit.shape[2:]:
        HW *= d
    if smooth < 0.0 or smooth > 1.0:
        raise ValueError("Smooth value should be in [0,1]")
    lo = smooth / (C - 1)
    hi = 1.0 - smooth
    assert lo <= hi, "clamp bounds require smooth/(C-1) <= 1-smooth"
    gamma_s = int(gamma) if float(gamma).is_integer() else float(gamma)

    itemsize = jnp.dtype(logit.dtype).itemsize
    sub_mult = _sublane_multiple(itemsize)
    vmem_cap = _vmem_capacity_bytes()
    s_total_raw = -(-HW // _LANES)                       # ceil(HW / 128)
    if sublane_tile is None:
        S = _pick_sublane_tile(s_total_raw, C, itemsize, hw_splits, vmem_cap)
    else:
        S = sublane_tile
    chunk = _pick_chunk(S, sub_mult)

    raw_tiles = -(-s_total_raw // S)
    n_tiles = _round_up(raw_tiles, hw_splits)
    tiles_per_split = n_tiles // hw_splits
    s_total = n_tiles * S
    pad = s_total * _LANES - HW
    needs_mask = pad > 0

    # Contiguous reshapes only; logits keep their native dtype (cast in-kernel).
    logit_r = logit.reshape(N, C, HW)
    target_r = target.reshape(N, 1, HW).astype(jnp.int32)
    if pad:
        # TODO(synk): jnp.pad copies the arrays; for huge HW prefer a cdiv-grid tail.
        logit_r = jnp.pad(logit_r, ((0, 0), (0, 0), (0, pad)))
        target_r = jnp.pad(target_r, ((0, 0), (0, 0), (0, pad)))
    logit_r = logit_r.reshape(N, C, s_total, _LANES)
    target_r = target_r.reshape(N, 1, s_total, _LANES)
    neg_alpha = -jnp.asarray(alpha, jnp.float32).reshape(C)

    kernel = functools.partial(
        _focal_kernel, num_classes=C, hw=HW, lo=lo, hi=hi, smooth=smooth,
        gamma=gamma_s, sublanes=S, chunk=chunk, tiles_per_split=tiles_per_split,
        needs_mask=needs_mask, track_sum=not probs_sum_to_one)

    partials = pl.pallas_call(
        kernel,
        out_shape=jax.ShapeDtypeStruct((N, hw_splits, 1, _LANES), jnp.float32),
        grid=(N, hw_splits, tiles_per_split),
        in_specs=[
            pl.BlockSpec((1, C, S, _LANES),
                         lambda n, p, t: (n, 0, p * tiles_per_split + t, 0)),
            pl.BlockSpec((1, 1, S, _LANES),
                         lambda n, p, t: (n, 0, p * tiles_per_split + t, 0)),
            pl.BlockSpec(memory_space=pltpu.MemorySpace.SMEM),
        ],
        out_specs=pl.BlockSpec((1, 1, 1, _LANES), lambda n, p, t: (n, p, 0, 0)),
        scratch_shapes=[pltpu.VMEM((chunk, _LANES), jnp.float32)],
        compiler_params=pltpu.CompilerParams(
            dimension_semantics=("parallel", "parallel", "arbitrary"),
            vmem_limit_bytes=int(min(vmem_cap // 2, 128 * 1024 * 1024))),
    )(logit_r, target_r, neg_alpha)

    per_batch = partials[:, :, 0, 0].sum(axis=1)          # (N,)
    if size_average:
        per_batch = per_batch / HW                        # == loss.view(N,-1).mean(1)
    return per_batch


def focal_loss_ref(logit, target, alpha, *, gamma=2, smooth=1e-5,
                   size_average=True):
    """Pure-JAX reference mirroring the PyTorch forward."""
    N, C = logit.shape[0], logit.shape[1]
    lg = jnp.transpose(logit.reshape(N, C, -1), (0, 2, 1)).reshape(-1, C)
    t = target.reshape(-1)
    oh = jax.nn.one_hot(t, C, dtype=jnp.float32)
    ohc = jnp.clip(oh, smooth / (C - 1), 1.0 - smooth)
    pt = jnp.sum(ohc * lg, axis=1) + smooth
    logpt = jnp.log(pt)
    a = alpha[t]
    loss = -1.0 * a * (1.0 - pt) ** gamma * logpt
    loss = loss.reshape(N, -1)
    return loss.mean(1) if size_average else loss.sum(1)


if __name__ == "__main__":
    key = jax.random.PRNGKey(0)
    k1, k2, k3, k4 = jax.random.split(key, 4)
    alpha = jnp.array([0.25, 0.5, 0.75, 1.0], dtype=jnp.float32)

    # 1) Default config: N=2, C=4, 16x16, f32, size_average=True.
    N, C, H, W = 2, 4, 16, 16
    logit = jax.nn.softmax(jax.random.normal(k1, (N, C, H, W), jnp.float32), axis=1)
    target = jax.random.randint(k2, (N, 1, H, W), 0, C, dtype=jnp.int32)
    out = focal_loss(logit, target, alpha)
    jax.block_until_ready(out)
    ref = focal_loss_ref(logit, target, alpha)
    assert out.shape == (N,), out.shape
    assert jnp.allclose(out, ref, atol=1e-5, rtol=1e-4), (out, ref)

    # 2) Multi-tile + multi-chunk + 2-way HW split (v7x dual-TC path), sum mode.
    H2 = W2 = 128
    logit2 = jax.nn.softmax(jax.random.normal(k3, (N, C, H2, W2), jnp.float32), axis=1)
    target2 = jax.random.randint(k4, (N, 1, H2, W2), 0, C, dtype=jnp.int32)
    out2 = focal_loss(logit2, target2, alpha, size_average=False,
                      hw_splits=2, sublane_tile=64)
    jax.block_until_ready(out2)
    ref2 = focal_loss_ref(logit2, target2, alpha, size_average=False)
    assert jnp.allclose(out2, ref2, atol=1e-2, rtol=1e-4), (out2, ref2)

    # 3) bf16 logits: streamed in native dtype, cast per-chunk inside the kernel.
    logit_bf16 = logit.astype(jnp.bfloat16)
    out3 = focal_loss(logit_bf16, target, alpha)
    jax.block_until_ready(out3)
    ref3 = focal_loss_ref(logit_bf16.astype(jnp.float32), target, alpha)
    assert jnp.allclose(out3, ref3, atol=1e-4, rtol=1e-4), (out3, ref3)

    # 4) Non-multiple-of-128 spatial size: wrapper pad + in-kernel mask.
    H4 = W4 = 10
    logit4 = jax.nn.softmax(jax.random.normal(k1, (N, C, H4, W4), jnp.float32), axis=1)
    target4 = jax.random.randint(k2, (N, 1, H4, W4), 0, C, dtype=jnp.int32)
    out4 = focal_loss(logit4, target4, alpha, size_average=True)
    jax.block_until_ready(out4)
    ref4 = focal_loss_ref(logit4, target4, alpha, size_average=True)
    assert jnp.allclose(out4, ref4, atol=1e-5, rtol=1e-4), (out4, ref4)

    # 5) Optional fast path for softmax inputs (sum_c p == 1), looser tolerance.
    out5 = focal_loss(logit, target, alpha, probs_sum_to_one=True)
    jax.block_until_ready(out5)
    assert jnp.allclose(out5, ref, atol=1e-4, rtol=1e-4), (out5, ref)

    print("KERNEL_OK")
</pallas_src>

<mosaic_0001>
module attributes {stable_mosaic.version = 11 : i64} {
  func.func @_focal_kernel(%arg0: i32, %arg1: i32, %arg2: i32, %arg3: memref<1x4x2x128xf32, #tpu.memory_space<vmem>>, %arg4: memref<1x1x2x128xi32, #tpu.memory_space<vmem>>, %arg5: memref<4xf32, #tpu.memory_space<smem>>, %arg6: memref<1x1x1x128xf32, #tpu.memory_space<vmem>>, %arg7: memref<2x128xf32, #tpu.memory_space<vmem>>) attributes {dimension_semantics = [#tpu.dimension_semantics<parallel>, #tpu.dimension_semantics<parallel>, #tpu.dimension_semantics<arbitrary>], iteration_bounds = array<i64: 2, 1, 1>, scalar_prefetch = 0 : i64, scratch_operands = 1 : i64, tpu.core_type = #tpu.core_type<tc>, window_params = [{transform_indices = @transform_0, window_bounds = array<i64: 1, 4, 2, 128>}, {transform_indices = @transform_1, window_bounds = array<i64: 1, 1, 2, 128>}, {transform_indices = @transform_2, window_bounds = array<i64: 4>}, {transform_indices = @transform_3, window_bounds = array<i64: 1, 1, 1, 128>}]} {
    %c0_i32 = arith.constant 0 : i32
    %0 = arith.cmpi eq, %arg2, %c0_i32 : i32
    %1 = arith.extui %0 : i1 to i32
    %c0_i32_0 = arith.constant 0 : i32
    %2 = arith.cmpi ne, %1, %c0_i32_0 : i32
    scf.if %2 {
      %cst_32 = arith.constant 0.000000e+00 : f32
      %70 = vector.broadcast %cst_32 : f32 to vector<2x128xf32>
      %c0_33 = arith.constant 0 : index
      %c0_34 = arith.constant 0 : index
      %71 = vector.load %arg7[%c0_33, %c0_34] : memref<2x128xf32, #tpu.memory_space<vmem>>, vector<2x128xf32>
      tpu.vector_store %arg7[%c0_33, %c0_34], %70 {strides = array<i32>} : memref<2x128xf32, #tpu.memory_space<vmem>>, vector<2x128xf32>,
    } else {
    }
    %c0 = arith.constant 0 : index
    %3 = memref.load %arg5[%c0] : memref<4xf32, #tpu.memory_space<smem>>
    %c1 = arith.constant 1 : index
    %4 = memref.load %arg5[%c1] : memref<4xf32, #tpu.memory_space<smem>>
    %c2 = arith.constant 2 : index
    %5 = memref.load %arg5[%c2] : memref<4xf32, #tpu.memory_space<smem>>
    %c3 = arith.constant 3 : index
    %6 = memref.load %arg5[%c3] : memref<4xf32, #tpu.memory_space<smem>>
    %c0_i32_1 = arith.constant 0 : i32
    %c2_i32 = arith.constant 2 : i32
    %7 = arith.muli %c0_i32_1, %c2_i32 : i32
    %8 = tpu.assume_multiple %7, 2 : i32
    %c0_2 = arith.constant 0 : index
    %c0_3 = arith.constant 0 : index
    %9 = arith.index_cast %8 : i32 to index
    %c0_4 = arith.constant 0 : index
    %10 = vector.load %arg4[%c0_2, %c0_3, %9, %c0_4] : memref<1x1x2x128xi32, #tpu.memory_space<vmem>>, vector<1x1x2x128xi32>
    %11 = vector.shape_cast %10 : vector<1x1x2x128xi32> to vector<2x128xi32>
    %cst = arith.constant 0.000000e+00 : f32
    %12 = vector.broadcast %cst : f32 to vector<2x128xf32>
    %cst_5 = arith.constant 0.000000e+00 : f32
    %13 = vector.broadcast %cst_5 : f32 to vector<2x128xf32>
    %cst_6 = arith.constant 0.000000e+00 : f32
    %14 = vector.broadcast %cst_6 : f32 to vector<2x128xf32>
    %c0_7 = arith.constant 0 : index
    %c0_8 = arith.constant 0 : index
    %15 = arith.index_cast %8 : i32 to index
    %c0_9 = arith.constant 0 : index
    %16 = vector.load %arg3[%c0_7, %c0_8, %15, %c0_9] : memref<1x4x2x128xf32, #tpu.memory_space<vmem>>, vector<1x1x2x128xf32>
    %17 = vector.shape_cast %16 : vector<1x1x2x128xf32> to vector<2x128xf32>
    %c0_i32_10 = arith.constant 0 : i32
    %18 = vector.broadcast %c0_i32_10 : i32 to vector<2x128xi32>
    %19 = arith.cmpi eq, %11, %18 : vector<2x128xi32>
    %20 = arith.addf %14, %17 : vector<2x128xf32>
    %21 = arith.select %19, %17, %12 : vector<2x128xi1>, vector<2x128xf32>
    %22 = vector.broadcast %3 : f32 to vector<2x128xf32>
    %23 = arith.select %19, %22, %13 : vector<2x128xi1>, vector<2x128xf32>
    %c0_11 = arith.constant 0 : index
    %c1_12 = arith.constant 1 : index
    %24 = arith.index_cast %8 : i32 to index
    %c0_13 = arith.constant 0 : index
    %25 = vector.load %arg3[%c0_11, %c1_12, %24, %c0_13] : memref<1x4x2x128xf32, #tpu.memory_space<vmem>>, vector<1x1x2x128xf32>
    %26 = vector.shape_cast %25 : vector<1x1x2x128xf32> to vector<2x128xf32>
    %c1_i32 = arith.constant 1 : i32
    %27 = vector.broadcast %c1_i32 : i32 to vector<2x128xi32>
    %28 = arith.cmpi eq, %11, %27 : vector<2x128xi32>
    %29 = arith.addf %20, %26 : vector<2x128xf32>
    %30 = arith.select %28, %26, %21 : vector<2x128xi1>, vector<2x128xf32>
    %31 = vector.broadcast %4 : f32 to vector<2x128xf32>
    %32 = arith.select %28, %31, %23 : vector<2x128xi1>, vector<2x128xf32>
    %c0_14 = arith.constant 0 : index
    %c2_15 = arith.constant 2 : index
    %33 = arith.index_cast %8 : i32 to index
    %c0_16 = arith.constant 0 : index
    %34 = vector.load %arg3[%c0_14, %c2_15, %33, %c0_16] : memref<1x4x2x128xf32, #tpu.memory_space<vmem>>, vector<1x1x2x128xf32>
    %35 = vector.shape_cast %34 : vector<1x1x2x128xf32> to vector<2x128xf32>
    %c2_i32_17 = arith.constant 2 : i32
    %36 = vector.broadcast %c2_i32_17 : i32 to vector<2x128xi32>
    %37 = arith.cmpi eq, %11, %36 : vector<2x128xi32>
    %38 = arith.addf %29, %35 : vector<2x128xf32>
    %39 = arith.select %37, %35, %30 : vector<2x128xi1>, vector<2x128xf32>
    %40 = vector.broadcast %5 : f32 to vector<2x128xf32>
    %41 = arith.select %37, %40, %32 : vector<2x128xi1>, vector<2x128xf32>
    %c0_18 = arith.constant 0 : index
    %c3_19 = arith.constant 3 : index
    %42 = arith.index_cast %8 : i32 to index
    %c0_20 = arith.constant 0 : index
    %43 = vector.load %arg3[%c0_18, %c3_19, %42, %c0_20] : memref<1x4x2x128xf32, #tpu.memory_space<vmem>>, vector<1x1x2x128xf32>
    %44 = vector.shape_cast %43 : vector<1x1x2x128xf32> to vector<2x128xf32>
    %c3_i32 = arith.constant 3 : i32
    %45 = vector.broadcast %c3_i32 : i32 to vector<2x128xi32>
    %46 = arith.cmpi eq, %11, %45 : vector<2x128xi32>
    %47 = arith.addf %38, %44 : vector<2x128xf32>
    %48 = arith.select %46, %44, %39 : vector<2x128xi1>, vector<2x128xf32>
    %49 = vector.broadcast %6 : f32 to vector<2x128xf32>
    %50 = arith.select %46, %49, %41 : vector<2x128xi1>, vector<2x128xf32>
    %cst_21 = arith.constant 3.33333332E-6 : f32
    %51 = vector.broadcast %cst_21 : f32 to vector<2x128xf32>
    %52 = arith.mulf %51, %47 : vector<2x128xf32>
    %cst_22 = arith.constant 0.999986648 : f32
    %53 = vector.broadcast %cst_22 : f32 to vector<2x128xf32>
    %54 = arith.mulf %53, %48 : vector<2x128xf32>
    %55 = arith.addf %52, %54 : vector<2x128xf32>
    %cst_23 = arith.constant 9.99999974E-6 : f32
    %56 = vector.broadcast %cst_23 : f32 to vector<2x128xf32>
    %57 = arith.addf %55, %56 : vector<2x128xf32>
    %58 = math.log %57 : vector<2x128xf32>
    %cst_24 = arith.constant 1.000000e+00 : f32
    %59 = vector.broadcast %cst_24 : f32 to vector<2x128xf32>
    %60 = arith.subf %59, %57 : vector<2x128xf32>
    %61 = arith.mulf %60, %60 : vector<2x128xf32>
    %62 = arith.mulf %50, %61 : vector<2x128xf32>
    %63 = arith.mulf %62, %58 : vector<2x128xf32>
    %c0_25 = arith.constant 0 : index
    %c0_26 = arith.constant 0 : index
    %64 = vector.load %arg7[%c0_25, %c0_26] : memref<2x128xf32, #tpu.memory_space<vmem>>, vector<2x128xf32>
    %65 = arith.addf %64, %63 : vector<2x128xf32>
    %c0_27 = arith.constant 0 : index
    %c0_28 = arith.constant 0 : index
    %66 = vector.load %arg7[%c0_27, %c0_28] : memref<2x128xf32, #tpu.memory_space<vmem>>, vector<2x128xf32>
    tpu.vector_store %arg7[%c0_27, %c0_28], %65 {strides = array<i32>} : memref<2x128xf32, #tpu.memory_space<vmem>>, vector<2x128xf32>,
    %c1_i32_29 = arith.constant 1 : i32
    %c0_i32_30 = arith.constant 0 : i32
    %67 = arith.cmpi eq, %arg2, %c0_i32_30 : i32
    %68 = arith.extui %67 : i1 to i32
    %c0_i32_31 = arith.constant 0 : i32
    %69 = arith.cmpi ne, %68, %c0_i32_31 : i32
    scf.if %69 {
      %c0_32 = arith.constant 0 : index
      %c0_33 = arith.constant 0 : index
      %70 = vector.load %arg7[%c0_32, %c0_33] : memref<2x128xf32, #tpu.memory_space<vmem>>, vector<2x128xf32>
      %71 = vector.shape_cast %70 : vector<2x128xf32> to vector<1x2x128xf32>
      %cst_34 = arith.constant dense<0.000000e+00> : vector<1xf32>
      %72 = vector.multi_reduction <add>, %71, %cst_34 [1, 2] : vector<1x2x128xf32> to vector<1xf32>
      %73 = vector.shape_cast %72 : vector<1xf32> to vector<1x1x1xf32>
      %74 = vector.extract %73[0, 0, 0] : f32 from vector<1x1x1xf32>
      %cst_35 = arith.constant 0.000000e+00 : f32
      %75 = vector.broadcast %cst_35 : f32 to vector<1x1x1x128xf32>
      %76 = vector.broadcast %74 : f32 to vector<1x1x1x128xf32>
      %77 = arith.addf %75, %76 : vector<1x1x1x128xf32>
      %c0_36 = arith.constant 0 : index
      %c0_37 = arith.constant 0 : index
      %c0_38 = arith.constant 0 : index
      %c0_39 = arith.constant 0 : index
      %78 = vector.load %arg6[%c0_36, %c0_37, %c0_38, %c0_39] : memref<1x1x1x128xf32, #tpu.memory_space<vmem>>, vector<1x1x1x128xf32>
      tpu.vector_store %arg6[%c0_36, %c0_37, %c0_38, %c0_39], %77 {strides = array<i32>} : memref<1x1x1x128xf32, #tpu.memory_space<vmem>>, vector<1x1x1x128xf32>,
    } else {
    }
    return
  }
  func.func @transform_0(%arg0: i32, %arg1: i32, %arg2: i32) -> (i32, i32, i32, i32) {
    %c1_i32 = arith.constant 1 : i32
    %0 = arith.muli %arg1, %c1_i32 : i32
    %1 = arith.addi %0, %arg2 : i32
    %c0_i32 = arith.constant 0 : i32
    %c0_i32_0 = arith.constant 0 : i32
    %c0_i32_1 = arith.constant 0 : i32
    return %arg0, %c0_i32, %1, %c0_i32_0 : i32, i32, i32, i32
  }
  func.func @transform_1(%arg0: i32, %arg1: i32, %arg2: i32) -> (i32, i32, i32, i32) {
    %c1_i32 = arith.constant 1 : i32
    %0 = arith.muli %arg1, %c1_i32 : i32
    %1 = arith.addi %0, %arg2 : i32
    %c0_i32 = arith.constant 0 : i32
    %c0_i32_0 = arith.constant 0 : i32
    %c0_i32_1 = arith.constant 0 : i32
    return %arg0, %c0_i32, %1, %c0_i32_0 : i32, i32, i32, i32
  }
  func.func @transform_2(%arg0: i32, %arg1: i32, %arg2: i32) -> i32 {
    %c0_i32 = arith.constant 0 : i32
    %c0_i32_0 = arith.constant 0 : i32
    return %c0_i32 : i32
  }
  func.func @transform_3(%arg0: i32, %arg1: i32, %arg2: i32) -> (i32, i32, i32, i32) {
    %c0_i32 = arith.constant 0 : i32
    %c0_i32_0 = arith.constant 0 : i32
    %c0_i32_1 = arith.constant 0 : i32
    return %arg0, %arg1, %c0_i32, %c0_i32_0 : i32, i32, i32, i32
  }
}

</mosaic_0001>

<bundles_post_ra>
// kernel: tpu_custom_call.1
= control target key start
LH: loop header
LB: loop body
LE: loop exit
PB: predicated region body
PF: predicated region fallthrough
CT: control target
= control target key end

     0   :  { %s985_s0 = inlined_call_operand.hbm [shape: f32[2,4,2,128], index: 0, kind: input, shape index: {}]   ;;  %s986_s1 = inlined_call_operand.hbm [shape: s32[2,1,2,128], index: 1, kind: input, shape index: {}]   ;;  %s987_s2 = inlined_call_operand.vmem [shape: f32[4], index: 2, kind: input, shape index: {}]   ;;  %s988_s3 = inlined_call_operand.hbm [shape: f32[2,1,1,128], index: 3, kind: output, shape index: {}]  }
   0x1   :  { %991 = sst [smem:[#allocation17_spill]] %s985_s0 }
   0x2   :  { %992 = sst [smem:[#allocation18_spill]] %s987_s2 }
   0x3   :  { %8 = vsyncpa [#allocation4], 0 }
   0x4   :  { %10 = vsyncpa [#allocation4 + $0x1], 0 }
   0x5   :  { %11 = vsyncpa [#allocation8], 0 }
   0x6   :  { %13 = vsyncpa [#allocation8 + $0x1], 0 }
   0x7   :  { %14 = vsyncpa [#allocation6], 0 }
   0x8   :  { %15 = vsyncpa [#allocation5], 0 }
   0x9   :  { %17 = vsyncpa [#allocation5 + $0x1], 0  ;;  %s777_s12 = smov 0   ;;  %s779_s13 = smov 0  }
   0xa   :  { %s781_s14 = smov 0   ;;  %s783_s15 = smov 0  }
   0xb   :  { %s785_s16 = smov 0   ;;  %s787_s17 = smov 0  }
   0xc LB: > { %s480_s18 = sadd.s32 4294967295, %s748_s17   ;;  %s481_s19 = sadd.s32 4294967294, %s748_s17   ;;  %s748_s17 = sphi %s787_s17, %s23_s17   ;;  %s744_s16 = sphi %s785_s16, %s1015_s16   ;;  %s740_s15 = sphi %s783_s15, %s1014_s15   ;;  %s736_s14 = sphi %s781_s14, %s1013_s14   ;;  %s732_s13 = sphi %s779_s13, %s1012_s13   ;;  %s728_s12 = sphi %s777_s12, %s1011_s12  }
   0xd   : > { %s53_s20 = sadd.s32 1, %s736_s14  ;;  %p60_p0 = scmp.ne.s32.totalorder %s736_s14, %s732_s13 }
   0xe   : > { %p61_p1 = scmp.eq.s32.totalorder %s748_s17, 0  ;;  %p66_p2 = scmp.ne.s32.totalorder %s732_s13, %s728_s12 }
   0xf   : > { %p815_p3 = scmp.eq.s32.totalorder %s480_s18, 0  ;;  %p143_p4 = scmp.eq.s32.totalorder %s480_s18, 1 }
  0x10   : > { %p819_p5 = por %p61_p1, %p60_p0  ;;  %p149_p6 = scmp.eq.s32.totalorder %s481_s19, 1 }
  0x11   : > { %p825_p7 = por %p815_p3, %p66_p2  ;;  %p829_p8 = por %p143_p4, %p60_p0 }
  0x12   : > { %p833_p9 = por %p149_p6, %p66_p2  ;;  %p482_p10 = scmp.ge.s32.totalorder %s748_s17, 1 }
  0x13   : > { %s996_s24 = scalar_select %p829_p8, 1, 0 }
  0x14   : > { %s997_s25 = scalar_select %p833_p9, 1, 0 }
  0x15   : > { %p156_p11 = scmp.lt.s32.totalorder %s748_s17, 3  ;;  %s998_s2 = sld [smem:[#allocation18_spill]] }
  0x16   : > { %p532_p0 = scmp.lt.s32.totalorder %s748_s17, 2  ;;  %s42_s5 = sadd.s32 1, %s744_s16 }
  0x17   : > { %p842_p12 = pnand %p482_p10, %p156_p11  ;;  %p863_p6 = scmp.ge.s32.totalorder %s42_s5, 2 }
  0x18   : > { %p852_p2 = pnand %p532_p0, %p819_p5  ;;  %s868_s7 = sand.u32 1, %s736_s14  }
  0x19   : > { %p516_p1 = pneg %p842_p12 }
  0x1b   : > { %s169_s28 = sshll.u32 %s998_s2, 4  ;;  %p858_p4 = pnand %p516_p1, %p815_p3  ;;  %s170_s28 = int_to_ptr.vmem [resolvable:$true] %s169_s28 }
  0x1c   : > { %s589_s8 = scalar_lea.vmem %s170_s28, 16  ;;  %p597_p13 = scmp.lt.s32.totalorder %s170_s28, %s170_s28 }
  0x1d   : > { %p590_p10 = scmp.ne.s32.totalorder %s170_s28, %s589_s8  ;;  %p591_p5 = pneg %p858_p4 }
  0x1e   : > { %p598_p9 = scmp.lt.s32.totalorder %s589_s8, %s589_s8 }
  0x1f   : > { %p592_p11 = pnand %p591_p5, %p590_p10 }
  0x20   : > { %p599_p1 = por %p598_p9, %p597_p13 }
  0x21   : > { %p593_p0 = pneg %p592_p11 }
  0x23   : > { %p600_p8 = pnand %p599_p1, %p593_p0 }
  0x25   : > { %603 = shalt.err (!%p600_p8)
}
  0x26   : > { %s750_s9 = smov [#allocation9]   ;;  %s1017_s5 = smov (%p863_p6, %s42_s5), 0 }
  0x27   : > { %519 = dma.vmem_to_smem (!%p858_p4), %s170_s28, 16, %s750_s9, [#allocation6]  }
  0x28   : > { %1003 = sst [smem:[#allocation15_spill]] %s1017_s5  ;;  %s485_s10 = sshll.u32 %s868_s7, 3 }
  0x29   : > { %s48_s11 = ssub.s32 %s744_s16, %s1017_s5  ;;  %s503_s18 = sshll.u32 %s744_s16, 7 }
  0x2a   : > { %p51_p8 = scmp.eq.s32.totalorder %s48_s11, 0  ;;  %s1004_s0 = sld [smem:[#allocation17_spill]] }
  0x2b   : > { %s184_s27 = scalar_lea.vmem [#allocation3], %s485_s10  ;;  %s181_s2 = scalar_lea.sflag [#allocation4], %s868_s7 }
  0x2c   : > { %s193_s4 = sshll.u32 %s184_s27, 4  ;;  %p606_p9 = pneg %p852_p2  ;;  %s194_s4 = int_to_ptr.vmem [resolvable:$true] %s193_s4 }
  0x2d   : > { %s888_s8 = scalar_select %p51_p8, %s736_s14, %s53_s20  }
  0x2e   : > { %s617_s28 = scalar_lea.vmem %s194_s4, 128  ;;  %s751_s6 = smov [#allocation3]  }
  0x2f   : > { %1005 = sst [smem:[#allocation16_spill]] %s888_s8  ;;  %p618_p13 = scmp.ne.s32.totalorder %s194_s4, %s617_s28 }
  0x30   : > { %s192_s26 = scalar_lea.hbm %s1004_s0, %s503_s18  ;;  %s622_s9 = sshll.u32 %s751_s6, 4  ;;  %s623_s9 = int_to_ptr.vmem [resolvable:$false] %s622_s9 }
  0x31   : > { %p620_p4 = pnand %p618_p13, %p606_p9  ;;  %s624_s11 = scalar_lea.vmem %s623_s9, 256 }
  0x32   : > { %p625_p10 = scmp.lt.s32.totalorder %s194_s4, %s623_s9  ;;  %p626_p5 = scmp.lt.s32.totalorder %s624_s11, %s617_s28 }
  0x33   : > { %p621_p6 = pneg %p620_p4 }
  0x34   : > { %p627_p11 = por %p626_p5, %p625_p10 }
  0x36   : > { %p628_p0 = pnand %p627_p11, %p621_p6 }
  0x38   : > { %631 = shalt.err (!%p628_p0)
}
  0x39   : > { %s752_s20 = smov 32   ;;  %s753_s10 = smov 2  }
  0x3a   : > { %523 = dma.hbm_to_vmem [thread:$0]  (!%p852_p2), %s192_s26, 128, %s194_s4, %s181_s2, %s752_s20, %s752_s20, %s753_s10  }
  0x3b   : > { %s488_s18 = sshll.u32 %s868_s7, 1  ;;  %s489_s19 = sshll.u32 %s744_s16, 5 }
  0x3c   : > { %s214_s6 = scalar_lea.hbm %s986_s1, %s489_s19  ;;  %s207_s9 = scalar_lea.vmem [#allocation7], %s488_s18 }
  0x3d   : > { %s216_s28 = sshll.u32 %s207_s9, 4  ;;  %s204_s11 = scalar_lea.sflag [#allocation8], %s868_s7  ;;  %s217_s28 = int_to_ptr.vmem [resolvable:$true] %s216_s28 }
  0x3e   : > { %s645_s0 = scalar_lea.vmem %s217_s28, 32  ;;  %s754_s5 = smov [#allocation7]  }
  0x3f   : > { %p646_p1 = scmp.ne.s32.totalorder %s217_s28, %s645_s0  ;;  %s650_s8 = sshll.u32 %s754_s5, 4  ;;  %s651_s8 = int_to_ptr.vmem [resolvable:$false] %s650_s8 }
  0x40   : > { %s652_s2 = scalar_lea.vmem %s651_s8, 64  ;;  %p653_p4 = scmp.lt.s32.totalorder %s217_s28, %s651_s8 }
  0x41   : > { %p648_p8 = pnand %p646_p1, %p606_p9  ;;  %p654_p6 = scmp.lt.s32.totalorder %s652_s2, %s645_s0 }
  0x43   : > { %p649_p13 = pneg %p648_p8  ;;  %p655_p10 = por %p654_p6, %p653_p4 }
  0x45   : > { %p656_p5 = pnand %p655_p10, %p649_p13 }
  0x47   : > { %659 = shalt.err (!%p656_p5)
}
  0x48   : > { %526 = dma.hbm_to_vmem [thread:$0]  (!%p852_p2), %s214_s6, 32, %s217_s28, %s204_s11  }
  0x49   : > { %225 = sbr.rel (%p842_p12) target bundleno = 343 (0x157), region = 32  ;;  %s912_s7 = sand.u32 (!%p842_p12), 1, %s732_s13  }
  0x4a   : > { %s491_s5 = sshll.u32 (!%p842_p12), %s912_s7, 3  ;;  %s228_s26 = scalar_lea.sflag (!%p842_p12), [#allocation4], %s912_s7 }
  0x4b   : > { %s231_s4 = scalar_lea.vmem (!%p842_p12), [#allocation3], %s491_s5 }
  0x4e   : > { %711 = dma.done.wait (%p825_p7), %s228_s26, 128  }
  0x4f   : > { %713 = vsyncadd (%p825_p7), %s228_s26, 4294967168  ;;  %s492_s0 = sshll.u32 %s912_s7, 1  ;;  %s237_s29 = scalar_lea.sflag [#allocation8], %s912_s7 }
  0x50   : > { %s240_s30 = scalar_lea.vmem [#allocation7], %s492_s0 }
  0x51   : > { %715 = dma.done.wait (%p825_p7), %s237_s29, 32  }
  0x52   : > { %717 = vsyncadd (%p825_p7), %s237_s29, 4294967264 }
  0x53   : > { %719 = dma.done.wait (%p815_p3), [#allocation6], 16  }
  0x54   : > { %721 = vsyncadd (%p815_p3), [#allocation6], 4294967280 }
  0x55   : > { %249 = sfence }
  0x56   : > { %v283_v0 = vld [vmem:[%s240_s30] sm:$0x3]  ;;  %v755_v1 = vmov 0.0   ;;  %v284_v2 = vld [vmem:[%s231_s4] sm:$0x3]  ;;  %s279_s23 = sld [smem:[#allocation9]] }
  0x57   : > { %278 = vst [vmem:[#allocation2] sm:$0x3] %v755_v1  ;;  %vm285_vm0 = vcmp.eq.s32.totalorder %v283_v0, 0  ;;  %vm293_vm1 = vcmp.eq.s32.totalorder %v283_v0, 1  ;;  %v497_v4 = vld [vmem:[%s231_s4 + $0x2] sm:$0x3] }
  0x58   : > { %v287_v3 = vsel %vm285_vm0, %v284_v2, 0.0  ;;  %vm301_vm2 = vcmp.eq.s32.totalorder %v283_v0, 2  ;;  %v294_v5 = vadd.f32 %v497_v4, %v284_v2  ;;  %v498_v7 = vld [vmem:[%s231_s4 + $0x4] sm:$0x3]  ;;  %v499_v8 = vld [vmem:[%s231_s4 + $0x6] sm:$0x3] }
  0x59   : > { %v295_v6 = vsel %vm293_vm1, %v497_v4, %v287_v3  ;;  %vm309_vm3 = vcmp.eq.s32.totalorder %v283_v0, 3  ;;  %s494_s21 = sld [smem:[#allocation9 + $0x1]]  ;;  %vm331_vm4 = vcmask 1041408   ;;  %s271_s10 = scalar_lea.vmem [#allocation10], %s912_s7 }
  0x5a   : > { %v303_v9 = vsel %vm301_vm2, %v498_v7, %v295_v6  ;;  %v302_v10 = vadd.f32 %v498_v7, %v294_v5  ;;  %s495_s8 = sld [smem:[#allocation9 + $0x2]]  ;;  %s359_s18 = sshll.u32 %s271_s10, 4  ;;  %s940_s18 = int_to_ptr.vmem [resolvable:$true] %s359_s18 }
  0x5b   : > { %v311_v11 = vsel %vm309_vm3, %v499_v8, %v303_v9  ;;  %s496_s20 = sld [smem:[#allocation9 + $0x3]]  ;;  %s500_s19 = sshll.u32 %s740_s15, 4 }
  0x5c   : > { %v310_v12 = vadd.f32 %v499_v8, %v302_v10  ;;  %v315_v13 = vmul.f32 0.99998665, %v311_v11  ;;  %v288_v16 = vstv %s279_s23  ;;  %s357_s9 = scalar_lea.hbm %s988_s3, %s500_s19  ;;  %s346_s28 = scalar_lea.sflag [#allocation5], %s912_s7 }
  0x5d   : > { %v289_v18 = vsel %vm285_vm0, %v288_v16, 0.0  ;;  %s660_s11 = scalar_lea.vmem %s940_s18, 16  ;;  %p1006_p7 = scmp.ne.s32.totalorder %s996_s24, 0 }
  0x5e   : > { %v314_v14 = vmul.f32 3.3333333e-06, %v310_v12  ;;  %v324_v30 = vld [vmem:[#allocation2] sm:$0x3]  ;;  %p661_p3 = scmp.ne.s32.totalorder %s940_s18, %s660_s11  ;;  %s756_s2 = smov [#allocation10]  }
  0x5f   : > { %v296_v19 = vstv %s494_s21  ;;  %s664_s15 = sshll.u32 %s756_s2, 4  ;;  %s665_s15 = int_to_ptr.vmem [resolvable:$false] %s664_s15 }
  0x60   : > { %v316_v15 = vadd.f32 %v315_v13, %v314_v14  ;;  %v297_v20 = vsel %vm293_vm1, %v296_v19, %v289_v18  ;;  %v304_v21 = vstv %s495_s8  ;;  %p662_p12 = pnand %p661_p3, %p1006_p7  ;;  %s666_s5 = scalar_lea.vmem %s665_s15, 32 }
  0x61   : > { %v305_v23 = vsel %vm301_vm2, %v304_v21, %v297_v20  ;;  %v312_v24 = vstv %s496_s20  ;;  %p667_p9 = scmp.lt.s32.totalorder %s940_s18, %s665_s15  ;;  %p668_p11 = scmp.lt.s32.totalorder %s666_s5, %s660_s11 }
  0x62   : > { %v317_v17 = vadd.f32 1e-05, %v316_v15  ;;  %v313_v26 = vsel %vm309_vm3, %v312_v24, %v305_v23  ;;  %p663_p2 = pneg %p662_p12 }
  0x63   : > { %p669_p0 = por %p668_p11, %p667_p9 }
  0x64   : > { %587 = vlog2.f32 %v317_v17  ;;  %v320_v22 = vsub.f32 1.0, %v317_v17 }
  0x65   : > { %p670_p1 = pnand %p669_p0, %p663_p2 }
  0x66   : > { %v321_v25 = vmul.f32 %v320_v22, %v320_v22 }
  0x68   : > { %v322_v27 = vmul.f32 %v321_v25, %v313_v26 }
  0x71   : > { %v588_v28 = vpop.eup %587 }
  0x72   : > { %v319_v29 = vmul.f32 0.6931472, %v588_v28 }
  0x74   : > { %v323_v31 = vmul.f32 %v322_v27, %v319_v29 }
  0x76   : > { %v325_v32 = vadd.f32 %v324_v30, %v323_v31 }
  0x78   : > { %326 = vst [vmem:[#allocation2] sm:$0x3] %v325_v32 }
  0x7f   : > { %v330_v33 = vld [vmem:[#allocation2] sm:$0x3] }
  0x80   : > { %v332_v34 = vsel %vm331_vm4, %v330_v33, 0.0 }
  0x81   : > { %333 = vadd.xlane.f32.xlu0 %v332_v34 }
 0x10a   : > { %v334_v35 = vpop.xlane.xlu0 %333 }
 0x10b   : > { %v335_v36 = vrot.slane %v334_v35, 4 }
 0x10d   : > { %v336_v37 = vadd.f32 %v335_v36, %v334_v35 }
 0x10f   : > { %v337_v38 = vrot.slane %v336_v37, 2 }
 0x111   : > { %v338_v39 = vadd.f32 %v337_v38, %v336_v37 }
 0x113   : > { %v339_v40 = vrot.slane %v338_v39, 1 }
 0x115   : > { %v340_v41 = vadd.f32 %v339_v40, %v338_v39 }
 0x117   : > { %504 = vpush %v340_v41 }
 0x148   : > { %s505_s22 = spop %504 }
 0x149   : > { %v342_v42 = vstv %s505_s22 }
 0x14a   : > { %344 = vst [vmem:[%s271_s10] sm:$0x1] %v342_v42 }
 0x14b   : > { %673 = shalt.err (!%p670_p1)
}
 0x14c   : > { %s674_s26 = scalar_lea.hbm %s357_s9, 16  ;;  %s678_s0 = scalar_lea.hbm %s988_s3, 32 }
 0x14d   : > { %p675_p8 = scmp.ne.s32.totalorder %s357_s9, %s674_s26  ;;  %p679_p6 = scmp.lt.s32.totalorder %s357_s9, %s988_s3 }
 0x14e   : > { %p680_p10 = scmp.lt.s32.totalorder %s678_s0, %s674_s26 }
 0x14f   : > { %p676_p13 = pnand %p675_p8, %p1006_p7 }
 0x150   : > { %p681_p5 = por %p680_p10, %p679_p6 }
 0x151   : > { %p677_p4 = pneg %p676_p13 }
 0x153   : > { %p682_p3 = pnand %p681_p5, %p677_p4 }
 0x155   : > { %685 = shalt.err (!%p682_p3)
}
 0x156   : > { %514 = dma.vmem_to_hbm [thread:$0]  (%p1006_p7), %s940_s18, 16, %s357_s9, %s346_s28  }
 0x157 PF: > { %s371_s23 = sand.u32 1, %s728_s12   ;;  %p1007_p12 = scmp.ne.s32.totalorder %s997_s25, 0 }
 0x158   : > { %p1008_p2 = scmp.ge.s32.totalorder %s748_s17, 2  ;;  %s372_s21 = scalar_lea.sflag [#allocation5], %s371_s23 }
 0x15a   : > { %p528_p9 = pnand %p1008_p2, %p1007_p12 }
 0x15c   : > { %p529_p11 = pneg %p528_p9 }
 0x15e   : > { %723 = dma.done.wait (%p529_p11), %s372_s21, 16  }
 0x15f   : > { %725 = vsyncadd (%p529_p11), %s372_s21, 4294967280  ;;  %s23_s17 = sadd.s32 1, %s748_s17   ;;  %s1009_s24 = sld [smem:[#allocation16_spill]] }
 0x160   : > { %p20_p0 = scmp.ge.s32.totalorder %s23_s17, 4   ;;  %s1010_s8 = sld [smem:[#allocation15_spill]] }
 0x161   : > { %s1011_s12 = smov %s732_s13  ;;  %s1012_s13 = smov %s736_s14 }
 0x162   : > { %s1014_s15 = smov %s744_s16  ;;  %22 = sbr.rel (!%p20_p0) target bundleno = 12 (0xc), region = 106 }
 0x165   : > { %s1013_s14 = smov %s1009_s24 }
 0x166   : > { %s1015_s16 = smov %s1010_s8 }
 0x167   :  { %376 = vsyncpa [#allocation4], 1 }
 0x168   :  { %378 = vsyncpa [#allocation4 + $0x1], 1 }
 0x169   :  { %379 = vsyncpa [#allocation8], 1 }
 0x16a   :  { %381 = vsyncpa [#allocation8 + $0x1], 1 }
 0x16b   :  { %382 = vsyncpa [#allocation5], 1 }
 0x16c   :  { %384 = vsyncpa [#allocation5 + $0x1], 1 }
 0x16d   :  { %385 = vsyncpa [#allocation6], 1 }
 0x16e   :  { %387 = vsyncpa [#allocation6 + $0x1], 1 }

</bundles_post_ra>
